<compile_context>
chip_gen: v5e
topology: v5e:2x2
jax: 0.10.0
libtpu: 0.0.40
codegen_flags: <defaults>
</compile_context>

<pallas_src>
import functools

import jax
import jax.numpy as jnp
import numpy as np
from jax import lax
from jax.experimental import pallas as pl
from jax.experimental.pallas import tpu as pltpu

EPS = 1e-5  # nn.GroupNorm default eps


def _round_up(v, m):
    return (v + m - 1) // m * m


def _tpu_vmem_capacity_bytes():
    """Physical VMEM per TensorCore (128 MiB on v5e/v6e, 64 MiB on v7x)."""
    try:
        cap = int(getattr(pltpu.get_tpu_info(), "vmem_capacity_bytes", 0))
        if cap > 0:
            return cap
    except Exception:
        pass
    return 64 << 20  # conservative (v7x-sized) fallback


def _num_tensorcores():
    """Best-effort TensorCores per device (2 on v7x, else 1)."""
    try:
        kind = jax.devices()[0].device_kind.lower()
    except Exception:
        return 1
    return 2 if ("v7" in kind or "7x" in kind) else 1


def _vmem_limit_bytes(need, budget):
    """Compiler VMEM limit: generous margin over the static estimate, never
    more than ~80% of physical VMEM (leave room for Mosaic scratch/semaphores)."""
    return int(min(max(2 * need, 32 << 20), max(budget, 32 << 20)))


# ---------------------------------------------------------------------------
# Fused single-pass kernel: one whole (C, HW) sample resident in VMEM.
# ---------------------------------------------------------------------------
def _fused_kernel(inv_n, g_ref, b_ref, x_ref, o_ref):
    # Exact two-pass mean/variance on the resident block (VMEM re-reads are
    # cheap; avoids E[x^2]-mean^2 cancellation), then one fused a*x + c.
    xf = x_ref[0].astype(jnp.float32)                 # (C, HW)
    mean = jnp.sum(xf) * inv_n
    d = xf - mean
    var = jnp.sum(d * d) * inv_n
    rstd = lax.rsqrt(var + EPS)
    a = g_ref[0].astype(jnp.float32) * rstd           # (C, 1)
    c = b_ref[0].astype(jnp.float32) - a * mean       # (C, 1)
    o_ref[0] = (a * xf + c).astype(o_ref.dtype)


# ---------------------------------------------------------------------------
# Two-phase tiled kernels (samples too large to hold resident in VMEM).
# ---------------------------------------------------------------------------
def _stats_kernel(hw, tile, c, x_ref, s1_ref, ssc_ref):
    # Per-tile partial statistics for Chan's parallel-variance combine:
    #   s1  = sum(x)                 over valid (non-OOB) lanes
    #   ssc = sum((x - tile_mean)^2) centered within the tile
    j = pl.program_id(1)
    valid = jnp.minimum(tile, hw - j * tile)          # ragged last tile
    x = x_ref[0].astype(jnp.float32)                  # (C, tile)
    in_bounds = lax.broadcasted_iota(jnp.int32, x.shape, 1) < valid
    xm = jnp.where(in_bounds, x, 0.0)
    s1 = jnp.sum(xm, keepdims=True)                   # (1, 1)
    m = s1 / (valid * c).astype(jnp.float32)
    d = jnp.where(in_bounds, x - m, 0.0)
    s1_ref[0, 0] = s1
    ssc_ref[0, 0] = jnp.sum(d * d, keepdims=True)


def _apply_kernel(a_ref, c_ref, x_ref, o_ref):
    x = x_ref[0].astype(jnp.float32)                  # (C, tile)
    o_ref[0] = (a_ref[0] * x + c_ref[0]).astype(o_ref.dtype)


# ---------------------------------------------------------------------------
# Wrapper
# ---------------------------------------------------------------------------
def time_cond_in(x, t, wg, bg, wb, bb, *, alias_input=False,
                 vmem_budget_bytes=None):
    """x: (B, C, H, W), t: (B, C), wg/wb: (C, C), bg/bb: (C,).

    `alias_input=True` writes the output into x's buffer (use when x is a
    consumed intermediate inside a larger jit; left off by default so a live
    jit parameter doesn't force XLA to insert a defensive copy).
    `vmem_budget_bytes` overrides the derived per-generation VMEM budget
    (mainly for testing the tiled path).
    """
    B, C, H, W = x.shape
    HW = H * W
    n = C * HW
    inv_n = 1.0 / float(n)
    out_dtype = x.dtype
    itemsize = jnp.dtype(x.dtype).itemsize

    # ---- 1x1 Conv1d on t == one batched channel-mixing matmul (MXU/XLA) ----
    tf = t.astype(jnp.float32)
    gamma = tf @ wg.astype(jnp.float32).T + bg.astype(jnp.float32)   # (B, C)
    beta = tf @ wb.astype(jnp.float32).T + bb.astype(jnp.float32)    # (B, C)
    gamma3 = gamma[:, :, None]                                       # (B, C, 1)
    beta3 = beta[:, :, None]

    # Flattened spatial -> lanes; channels -> sublanes.  No padding: full-extent
    # block dims are legal even when C % 8 != 0 or HW % 128 != 0.
    x2 = x.reshape(B, C, HW)            # free reshape, no HBM copy

    # ---- generation-aware VMEM budget ----
    if vmem_budget_bytes is None:
        vmem_budget = int(_tpu_vmem_capacity_bytes() * 0.8)
    else:
        vmem_budget = int(vmem_budget_bytes)
    ncores = _num_tensorcores()

    # Fused path cost: 2x(in) + 2x(out) double buffers + f32 temporaries.
    blk = C * HW * itemsize
    f32blk = C * HW * 4
    n_tmp = 3 if itemsize >= 4 else 4
    fused_need = 4 * blk + n_tmp * f32blk + (1 << 20)
    fused = fused_need <= vmem_budget
    # v7x: a single fused grid step (B == 1) leaves one TensorCore idle;
    # route such samples to the tile-parallel two-phase path.
    if fused and B == 1 and ncores >= 2 and HW >= 256:
        fused = False

    if fused:
        out = pl.pallas_call(
            functools.partial(_fused_kernel, inv_n),
            out_shape=jax.ShapeDtypeStruct((B, C, HW), out_dtype),
            grid_spec=pltpu.PrefetchScalarGridSpec(
                num_scalar_prefetch=0,
                grid=(B,),
                in_specs=[
                    pl.BlockSpec((1, C, 1), lambda b: (b, 0, 0)),    # gamma
                    pl.BlockSpec((1, C, 1), lambda b: (b, 0, 0)),    # beta
                    pl.BlockSpec((1, C, HW), lambda b: (b, 0, 0)),   # x
                ],
                out_specs=pl.BlockSpec((1, C, HW), lambda b: (b, 0, 0)),
            ),
            compiler_params=pltpu.CompilerParams(
                dimension_semantics=("parallel",),
                vmem_limit_bytes=_vmem_limit_bytes(fused_need, vmem_budget),
            ),
            input_output_aliases=({2: 0} if alias_input else {}),
        )(gamma3, beta3, x2)
        return out.reshape(B, C, H, W)

    # ---------------- two-phase tiled path (3 HBM passes) -------------------
    # Lane-tile sized so the apply phase's double buffers + f32 temps fit the
    # budget; no HW round-up — the ragged last tile is handled in-kernel.
    hw128 = _round_up(HW, 128)
    per_lane = C * (4 * itemsize + 12)          # 2 in + 2 out bufs + f32 temps
    tile = max(128, (vmem_budget // per_lane) // 128 * 128)
    tile = min(tile, hw128)
    if B == 1 and ncores >= 2 and HW >= 256 and tile >= HW:
        tile = _round_up((HW + 1) // 2, 128)    # split so both cores stream
    if tile >= HW:
        tile = HW                               # single full-extent tile
    n_tiles = (HW + tile - 1) // tile
    tiled_need = per_lane * tile + (1 << 20)
    vmem_limit = _vmem_limit_bytes(tiled_need, vmem_budget)

    # Phase 1: per-tile (sum, centered sum-of-squares); fully parallel grid.
    s1, ssc = pl.pallas_call(
        functools.partial(_stats_kernel, HW, tile, C),
        out_shape=(
            jax.ShapeDtypeStruct((B, n_tiles, 1, 1), jnp.float32),
            jax.ShapeDtypeStruct((B, n_tiles, 1, 1), jnp.float32),
        ),
        grid_spec=pltpu.PrefetchScalarGridSpec(
            num_scalar_prefetch=0,
            grid=(B, n_tiles),
            in_specs=[pl.BlockSpec((1, C, tile), lambda b, j: (b, 0, j))],
            out_specs=(
                pl.BlockSpec((1, 1, 1, 1), lambda b, j: (b, j, 0, 0)),
                pl.BlockSpec((1, 1, 1, 1), lambda b, j: (b, j, 0, 0)),
            ),
        ),
        compiler_params=pltpu.CompilerParams(
            dimension_semantics=("parallel", "parallel"),
            vmem_limit_bytes=vmem_limit,
        ),
    )(x2)

    # Tiny interlude on (B, n_tiles)/(B, C) scalars: Chan's parallel-variance
    # combine, then fold norm + modulation into per-channel a, c.
    s1 = s1[..., 0, 0]                                    # (B, n_tiles)
    ssc = ssc[..., 0, 0]
    cnt = jnp.asarray(
        np.minimum(tile, HW - np.arange(n_tiles) * tile) * C, jnp.float32)
    mean = jnp.sum(s1, axis=1) * inv_n                    # (B,)
    m_t = s1 / cnt                                        # (B, n_tiles)
    m2 = jnp.sum(ssc + cnt * jnp.square(m_t - mean[:, None]), axis=1)
    rstd = lax.rsqrt(m2 * inv_n + EPS)                    # (B,)
    a3 = gamma3 * rstd[:, None, None]                     # (B, C, 1)
    c3 = beta3 - a3 * mean[:, None, None]                 # (B, C, 1)

    # Phase 2: stream the tiles once more applying a*x + c.
    out = pl.pallas_call(
        _apply_kernel,
        out_shape=jax.ShapeDtypeStruct((B, C, HW), out_dtype),
        grid_spec=pltpu.PrefetchScalarGridSpec(
            num_scalar_prefetch=0,
            grid=(B, n_tiles),
            in_specs=[
                pl.BlockSpec((1, C, 1), lambda b, j: (b, 0, 0)),     # a
                pl.BlockSpec((1, C, 1), lambda b, j: (b, 0, 0)),     # c
                pl.BlockSpec((1, C, tile), lambda b, j: (b, 0, j)),  # x
            ],
            out_specs=pl.BlockSpec((1, C, tile), lambda b, j: (b, 0, j)),
        ),
        compiler_params=pltpu.CompilerParams(
            dimension_semantics=("parallel", "parallel"),
            vmem_limit_bytes=vmem_limit,
        ),
        input_output_aliases=({2: 0} if alias_input else {}),
    )(a3, c3, x2)
    return out.reshape(B, C, H, W)


def time_cond_in_reference(x, t, wg, bg, wb, bb):
    """Pure-JAX reference of the PyTorch forward pass."""
    B, C, H, W = x.shape
    xf = x.astype(jnp.float32).reshape(B, -1)
    mean = xf.mean(axis=1, keepdims=True)
    var = ((xf - mean) ** 2).mean(axis=1, keepdims=True)
    xn = ((xf - mean) / jnp.sqrt(var + EPS)).reshape(B, C, H, W)
    gamma = t @ wg.T + bg                     # Conv1d(C, C, 1) on (B, C, 1)
    beta = t @ wb.T + bb
    return gamma[:, :, None, None] * xn + beta[:, :, None, None]


if __name__ == "__main__":
    key = jax.random.PRNGKey(0)
    kx, kt, kwg, kbg, kwb, kbb, kx2, kt2 = jax.random.split(key, 8)

    # ---- Case 1/2: small aligned shapes; fused path + forced tiled path ----
    B, C, H, W = 2, 4, 16, 16
    x = jax.random.normal(kx, (B, C, H, W), dtype=jnp.float32)
    t = jax.random.normal(kt, (B, C), dtype=jnp.float32)
    wg = jax.random.normal(kwg, (C, C), dtype=jnp.float32) * 0.1
    bg = jax.random.normal(kbg, (C,), dtype=jnp.float32) * 0.1
    wb = jax.random.normal(kwb, (C, C), dtype=jnp.float32) * 0.1
    bb = jax.random.normal(kbb, (C,), dtype=jnp.float32) * 0.1
    ref = time_cond_in_reference(x, t, wg, bg, wb, bb)

    out_fused = jax.block_until_ready(jax.jit(time_cond_in)(x, t, wg, bg, wb, bb))
    assert out_fused.shape == (B, C, H, W)
    assert jnp.allclose(out_fused, ref, atol=1e-4, rtol=1e-4), "fused path mismatch"

    out_tiled = jax.block_until_ready(
        time_cond_in(x, t, wg, bg, wb, bb, vmem_budget_bytes=16 * 1024))
    assert jnp.allclose(out_tiled, ref, atol=1e-4, rtol=1e-4), "tiled path mismatch"

    # ---- Case 3: non-aligned shapes (C % 8 != 0, HW % 128 != 0):
    # full-extent blocks + in-kernel ragged-tile masking, no padding ----
    B2, C2, H2, W2 = 2, 5, 16, 18            # HW = 288
    x2 = jax.random.normal(kx2, (B2, C2, H2, W2), dtype=jnp.float32)
    t2 = jax.random.normal(kt2, (B2, C2), dtype=jnp.float32)
    wg2 = jax.random.normal(kwg, (C2, C2), dtype=jnp.float32) * 0.1
    bg2 = jax.random.normal(kbg, (C2,), dtype=jnp.float32) * 0.1
    wb2 = jax.random.normal(kwb, (C2, C2), dtype=jnp.float32) * 0.1
    bb2 = jax.random.normal(kbb, (C2,), dtype=jnp.float32) * 0.1
    ref2 = time_cond_in_reference(x2, t2, wg2, bg2, wb2, bb2)

    out_fused2 = jax.block_until_ready(time_cond_in(x2, t2, wg2, bg2, wb2, bb2))
    assert jnp.allclose(out_fused2, ref2, atol=1e-4, rtol=1e-4), \
        "fused path (ragged shapes) mismatch"

    out_tiled2 = jax.block_until_ready(
        time_cond_in(x2, t2, wg2, bg2, wb2, bb2, vmem_budget_bytes=16 * 1024))
    assert jnp.allclose(out_tiled2, ref2, atol=1e-4, rtol=1e-4), \
        "tiled path (ragged shapes) mismatch"

    print("KERNEL_OK")
</pallas_src>

<mosaic_0001>
module attributes {stable_mosaic.version = 11 : i64} {
  func.func @_fused_kernel(%arg0: i32, %arg1: memref<1x4x1xf32, #tpu.memory_space<vmem>>, %arg2: memref<1x4x1xf32, #tpu.memory_space<vmem>>, %arg3: memref<1x4x256xf32, #tpu.memory_space<vmem>>, %arg4: memref<1x4x256xf32, #tpu.memory_space<vmem>>) attributes {dimension_semantics = [#tpu.dimension_semantics<parallel>], iteration_bounds = array<i64: 2>, scalar_prefetch = 0 : i64, scratch_operands = 0 : i64, tpu.core_type = #tpu.core_type<tc>, window_params = [{transform_indices = @transform_0, window_bounds = array<i64: 1, 4, 1>}, {transform_indices = @transform_1, window_bounds = array<i64: 1, 4, 1>}, {transform_indices = @transform_2, window_bounds = array<i64: 1, 4, 256>}, {transform_indices = @transform_3, window_bounds = array<i64: 1, 4, 256>}]} {
    %c0 = arith.constant 0 : index
    %c0_0 = arith.constant 0 : index
    %c0_1 = arith.constant 0 : index
    %0 = vector.load %arg3[%c0, %c0_0, %c0_1] : memref<1x4x256xf32, #tpu.memory_space<vmem>>, vector<1x4x256xf32>
    %1 = vector.shape_cast %0 : vector<1x4x256xf32> to vector<4x256xf32>
    %2 = vector.shape_cast %1 : vector<4x256xf32> to vector<1x4x256xf32>
    %cst = arith.constant dense<0.000000e+00> : vector<1xf32>
    %3 = vector.multi_reduction <add>, %2, %cst [1, 2] : vector<1x4x256xf32> to vector<1xf32>
    %4 = vector.shape_cast %3 : vector<1xf32> to vector<1x1x1xf32>
    %5 = vector.extract %4[0, 0, 0] : f32 from vector<1x1x1xf32>
    %cst_2 = arith.constant 9.765625E-4 : f32
    %6 = arith.mulf %5, %cst_2 : f32
    %7 = vector.broadcast %6 : f32 to vector<4x256xf32>
    %8 = arith.subf %1, %7 : vector<4x256xf32>
    %9 = arith.mulf %8, %8 : vector<4x256xf32>
    %10 = vector.shape_cast %9 : vector<4x256xf32> to vector<1x4x256xf32>
    %cst_3 = arith.constant dense<0.000000e+00> : vector<1xf32>
    %11 = vector.multi_reduction <add>, %10, %cst_3 [1, 2] : vector<1x4x256xf32> to vector<1xf32>
    %12 = vector.shape_cast %11 : vector<1xf32> to vector<1x1x1xf32>
    %13 = vector.extract %12[0, 0, 0] : f32 from vector<1x1x1xf32>
    %cst_4 = arith.constant 9.765625E-4 : f32
    %14 = arith.mulf %13, %cst_4 : f32
    %cst_5 = arith.constant 9.99999974E-6 : f32
    %15 = arith.addf %14, %cst_5 : f32
    %16 = math.rsqrt %15 : f32
    %c0_6 = arith.constant 0 : index
    %c0_7 = arith.constant 0 : index
    %c0_8 = arith.constant 0 : index
    %17 = vector.load %arg1[%c0_6, %c0_7, %c0_8] : memref<1x4x1xf32, #tpu.memory_space<vmem>>, vector<1x4x1xf32>
    %18 = vector.shape_cast %17 : vector<1x4x1xf32> to vector<4x1xf32>
    %19 = vector.broadcast %16 : f32 to vector<4x1xf32>
    %20 = arith.mulf %18, %19 : vector<4x1xf32>
    %c0_9 = arith.constant 0 : index
    %c0_10 = arith.constant 0 : index
    %c0_11 = arith.constant 0 : index
    %21 = vector.load %arg2[%c0_9, %c0_10, %c0_11] : memref<1x4x1xf32, #tpu.memory_space<vmem>>, vector<1x4x1xf32>
    %22 = vector.shape_cast %21 : vector<1x4x1xf32> to vector<4x1xf32>
    %23 = vector.broadcast %6 : f32 to vector<4x1xf32>
    %24 = arith.mulf %20, %23 : vector<4x1xf32>
    %25 = arith.subf %22, %24 : vector<4x1xf32>
    %26 = vector.broadcast %20 : vector<4x1xf32> to vector<4x256xf32>
    %27 = arith.mulf %26, %1 : vector<4x256xf32>
    %28 = vector.broadcast %25 : vector<4x1xf32> to vector<4x256xf32>
    %29 = arith.addf %27, %28 : vector<4x256xf32>
    %c0_12 = arith.constant 0 : index
    %c0_13 = arith.constant 0 : index
    %c0_14 = arith.constant 0 : index
    %30 = vector.load %arg4[%c0_12, %c0_13, %c0_14] : memref<1x4x256xf32, #tpu.memory_space<vmem>>, vector<1x4x256xf32>
    %31 = vector.shape_cast %30 : vector<1x4x256xf32> to vector<4x256xf32>
    %32 = vector.shape_cast %29 : vector<4x256xf32> to vector<1x4x256xf32>
    tpu.vector_store %arg4[%c0_12, %c0_13, %c0_14], %32 {strides = array<i32>} : memref<1x4x256xf32, #tpu.memory_space<vmem>>, vector<1x4x256xf32>,
    return
  }
  func.func @transform_0(%arg0: i32) -> (i32, i32, i32) {
    %c0_i32 = arith.constant 0 : i32
    %c0_i32_0 = arith.constant 0 : i32
    %c0_i32_1 = arith.constant 0 : i32
    return %arg0, %c0_i32, %c0_i32_0 : i32, i32, i32
  }
  func.func @transform_1(%arg0: i32) -> (i32, i32, i32) {
    %c0_i32 = arith.constant 0 : i32
    %c0_i32_0 = arith.constant 0 : i32
    %c0_i32_1 = arith.constant 0 : i32
    return %arg0, %c0_i32, %c0_i32_0 : i32, i32, i32
  }
  func.func @transform_2(%arg0: i32) -> (i32, i32, i32) {
    %c0_i32 = arith.constant 0 : i32
    %c0_i32_0 = arith.constant 0 : i32
    %c0_i32_1 = arith.constant 0 : i32
    return %arg0, %c0_i32, %c0_i32_0 : i32, i32, i32
  }
  func.func @transform_3(%arg0: i32) -> (i32, i32, i32) {
    %c0_i32 = arith.constant 0 : i32
    %c0_i32_0 = arith.constant 0 : i32
    %c0_i32_1 = arith.constant 0 : i32
    return %arg0, %c0_i32, %c0_i32_0 : i32, i32, i32
  }
}

</mosaic_0001>

<bundles_post_ra>
// kernel: time_cond_in.1
= control target key start
LH: loop header
LB: loop body
LE: loop exit
PB: predicated region body
PF: predicated region fallthrough
CT: control target
= control target key end

     0   :  { %s434_s12 = smov 0   ;;  %s470_s0 = inlined_call_operand.vmem [shape: f32[2,4,1], index: 0, kind: input, shape index: {}]   ;;  %s471_s1 = inlined_call_operand.vmem [shape: f32[2,4,1], index: 1, kind: input, shape index: {}]   ;;  %s472_s2 = inlined_call_operand.vmem [shape: f32[2,4,256], index: 2, kind: input, shape index: {}]   ;;  %s473_s3 = inlined_call_operand.vmem [shape: f32[2,4,256], index: 3, kind: output, shape index: {}]  }
   0x1 LB: > { %s371_s13 = sadd.s32 4294967295, %s411_s12   ;;  %p375_p0 = scmp.ge.s32.totalorder %s411_s12, 1  ;;  %s411_s12 = sphi %s434_s12, %s13_s12  }
   0x2   : > { %p155_p1 = scmp.lt.s32.totalorder %s411_s12, 3 }
   0x4   : > { %p156_p2 = pnand %p375_p0, %p155_p1 }
   0x5   : > { %p187_p3 = scmp.lt.s32.totalorder (!%p156_p2), %s371_s13, 1 }
   0x6   : > { %159 = sbr.rel (%p156_p2) target bundleno = 605 (0x25d), region = 32 }
   0xb   : > { %s475_s13 = smov (!%p187_p3, %s371_s13), 1  ;;  %vm212_vm0 = vcmask 1043456   ;;  %v413_v36 = vmov 0  }
   0xc   : > { %s384_s14 = sshll.u32 %s475_s13, 3  ;;  %401 = vset.pattern.permute.xlu1 %v413_v36  ;;  %402 = vset.pattern.permute.xlu0 %v413_v36  ;;  %s376_s23 = sshll.u32 %s475_s13, 2 }
   0xd   : > { %s199_s17 = scalar_lea.vmem %s472_s2, %s384_s14  ;;  %s190_s26 = scalar_lea.vmem %s470_s0, %s376_s23 }
   0xe   : > { %v205_v0 = vld [vmem:[%s199_s17] sm:$0xff]  ;;  %s194_s30 = scalar_lea.vmem %s471_s1, %s376_s23  ;;  %s204_s6 = scalar_lea.vmem %s473_s3, %s384_s14 }
   0xf   : > { %207 = vst [vmem:[#allocation1] ss:$2 sm:$0xff] %v205_v0  ;;  %v261_v37 = vld [vmem:[%s190_s26] sm:$0xf] }
  0x10   : > { %v264_v41 = vld [vmem:[%s194_s30] sm:$0xf] }
  0x16   : > { %v208_v1 = vld.sshfl [vmem:[#allocation1] sm:$0xff pattern:$0x75316420]  ;;  %v209_v2 = vld.sshfl [vmem:[#allocation1 + $0x8] sm:$0xff pattern:$0x75316420] }
  0x17   : > { %v213_v3 = vsel %vm212_vm0, %v208_v1, 0.0  ;;  %v214_v4 = vsel %vm212_vm0, %v209_v2, 0.0 }
  0x18   : > { %v215_v5 = vadd.f32 %v214_v4, %v213_v3 }
  0x1a   : > { %216 = vadd.xlane.f32.xlu0 %v215_v5 }
  0x8d   : > { %v217_v6 = vpop.xlane.xlu0 %216 }
  0x8e   : > { %v218_v7 = vrot.slane %v217_v6, 4 }
  0x90   : > { %v219_v8 = vadd.f32 %v218_v7, %v217_v6 }
  0x92   : > { %v220_v9 = vrot.slane %v219_v8, 2 }
  0x94   : > { %v221_v10 = vadd.f32 %v220_v9, %v219_v8 }
  0x96   : > { %v222_v11 = vrot.slane %v221_v10, 1 }
  0x98   : > { %v223_v12 = vadd.f32 %v222_v11, %v221_v10 }
  0x9a   : > { %386 = vpush %v223_v12 }
  0xcb   : > { %s387_s18 = spop %386 }
  0xcc   : > { %s225_s19 = smul.f32 0.0009765625, %s387_s18 }
  0xce   : > { %v226_v13 = vstv %s225_s19 }
  0xcf   : > { %v227_v14 = vsub.f32 %v205_v0, %v226_v13 }
  0xd1   : > { %v228_v15 = vmul.f32 %v227_v14, %v227_v14 }
  0xd3   : > { %230 = vst [vmem:[#allocation1] ss:$2 sm:$0xff] %v228_v15 }
  0xda   : > { %v231_v16 = vld.sshfl [vmem:[#allocation1] sm:$0xff pattern:$0x75316420]  ;;  %v232_v17 = vld.sshfl [vmem:[#allocation1 + $0x8] sm:$0xff pattern:$0x75316420] }
  0xdb   : > { %v235_v18 = vsel %vm212_vm0, %v231_v16, 0.0  ;;  %v236_v19 = vsel %vm212_vm0, %v232_v17, 0.0  ;;  %272 = vst [vmem:[#allocation1] ss:$2 sm:$0xff] %v205_v0 }
  0xdc   : > { %v237_v20 = vadd.f32 %v236_v19, %v235_v18 }
  0xde   : > { %238 = vadd.xlane.f32.xlu0 %v237_v20 }
  0xe2   : > { %v274_v44 = vld.sshfl [vmem:[#allocation1 + $0x8] sm:$0xff pattern:$0x75316420]  ;;  %v273_v45 = vld.sshfl [vmem:[#allocation1] sm:$0xff pattern:$0x75316420] }
 0x151   : > { %v239_v21 = vpop.xlane.xlu0 %238 }
 0x152   : > { %v240_v22 = vrot.slane %v239_v21, 4 }
 0x154   : > { %v241_v23 = vadd.f32 %v240_v22, %v239_v21 }
 0x156   : > { %v242_v24 = vrot.slane %v241_v23, 2 }
 0x158   : > { %v243_v25 = vadd.f32 %v242_v24, %v241_v23 }
 0x15a   : > { %v244_v26 = vrot.slane %v243_v25, 1 }
 0x15c   : > { %v245_v27 = vadd.f32 %v244_v26, %v243_v25 }
 0x15e   : > { %388 = vpush %v245_v27 }
 0x18f   : > { %s389_s20 = spop %388 }
 0x190   : > { %s247_s21 = smul.f32 0.0009765625, %s389_s20 }
 0x192   : > { %s248_s22 = sadd.f32 1e-05, %s247_s21 }
 0x194   : > { %v249_v28 = vstv %s248_s22 }
 0x195   : > { %403 = vrsqrt.f32 %v249_v28  ;;  %vm256_vm2 = vweird.f32 %v249_v28 }
 0x19b   : > { %v404_v29 = vpop.eup %403 }
 0x19c   : > { %v251_v30 = vmul.f32 %v404_v29, %v249_v28  ;;  %vm257_vm1 = vweird.f32 %v404_v29 }
 0x19d   : > { %vm258_vm3 = vmor %vm256_vm2, %vm257_vm1 }
 0x19e   : > { %v252_v31 = vmul.f32 %v404_v29, %v251_v30 }
 0x1a0   : > { %v253_v32 = vmul.f32 0.5, %v252_v31 }
 0x1a2   : > { %v254_v33 = vsub.f32 1.5, %v253_v32 }
 0x1a4   : > { %v255_v34 = vmul.f32 %v404_v29, %v254_v33 }
 0x1a6   : > { %v259_v35 = vsel %vm258_vm3, %v404_v29, %v255_v34 }
 0x1a7   : > { %390 = vpush %v259_v35 }
 0x1d8   : > { %s391_s27 = spop %390 }
 0x1d9   : > { %v262_v38 = vstv %s391_s27 }
 0x1da   : > { %v263_v39 = vmul.f32 %v262_v38, %v261_v37 }
 0x1dc   : > { %269 = vperm.xlu1 %401, %v263_v39   ;;  %v265_v40 = vmul.f32 %v263_v39, %v226_v13 }
 0x1de   : > { %v266_v42 = vsub.f32 %v264_v41, %v265_v40 }
 0x1e4   : > { %281 = vperm.xlu1 %401, %v266_v42  }
 0x24e   : > { %v270_v43 = vpop.permute.xlu1 %269 }
 0x24f   : > { %v278_v46 = vmul.f32 %v274_v44, %v270_v43  ;;  %v277_v48 = vmul.f32 %v273_v45, %v270_v43 }
 0x256   : > { %v282_v47 = vpop.permute.xlu1 %281 }
 0x257   : > { %v285_v49 = vadd.f32 %v282_v47, %v278_v46  ;;  %v284_v50 = vadd.f32 %v282_v47, %v277_v48 }
 0x259   : > { %v288_v51 = vrot.slane %v285_v49, 4 }
 0x25b   : > { %v289_v52 = vsel %vm212_vm0, %v284_v50, %v288_v51 }
 0x25c   : > { %291 = vst [vmem:[%s204_s6] sm:$0xff] %v289_v52 }
 0x25d PF: > { %s13_s12 = sadd.s32 1, %s411_s12  }
 0x25e   : > { %p10_p4 = scmp.ge.s32.totalorder %s13_s12, 4  }
 0x260   :  { %12 = sbr.rel (!%p10_p4) target bundleno = 1 (0x1), region = 68 }

</bundles_post_ra>
